<compile_context>
chip_gen: v7x
topology: tpu7x:2x2x1
jax: 0.10.0
libtpu: 0.0.40
codegen_flags: <defaults>
</compile_context>

<pallas_src>
import functools

import jax
import jax.numpy as jnp
from jax import lax
from jax.experimental import pallas as pl
from jax.experimental.pallas import tpu as pltpu

LANES = 128
SUBLANES = 8
ROW_ALIGN = 16          # block rows valid for both f32 (8) and bf16 (16) packing
MAX_TILE_ROWS = 4096    # (4096,128) f32 block = 2 MiB; 2 inputs x 2 buffers = 8 MiB VMEM


def _cdiv(a: int, b: int) -> int:
    return -(-a // b)


def _floor_align(x: int, m: int) -> int:
    return (x // m) * m


def _num_shards() -> int:
    """Use 2 TensorCore shards only where the chip actually has 2 TCs (v7x)."""
    try:
        kind = jax.devices()[0].device_kind.lower()
    except Exception:
        return 1
    return 2 if ("v7" in kind or "7x" in kind) else 1


def _edge_mask(tile_rows: int, rem: int):
    """Validity mask for the single ragged boundary tile (rem is static)."""
    if rem % LANES == 0:
        rid = lax.broadcasted_iota(jnp.int32, (tile_rows, LANES), 0)
        return rid < (rem // LANES)
    rid = lax.broadcasted_iota(jnp.int32, (tile_rows, LANES), 0)
    cid = lax.broadcasted_iota(jnp.int32, (tile_rows, LANES), 1)
    return rid * LANES + cid < rem


def _gan_d_loss_kernel(real_ref, fake_ref, out_r_ref, out_f_ref, *,
                       tile_rows: int, k_steps: int, n_real: int, n_fake: int):
    """Accumulate per-lane sums of softplus(-real) and softplus(+fake)."""
    p = pl.program_id(0)          # "parallel" shard axis (megacore on v7x)
    k = pl.program_id(1)          # "arbitrary" reduction axis
    t = p * k_steps + k           # global row-tile index
    tile_elems = tile_rows * LANES

    @pl.when(k == 0)
    def _():
        out_r_ref[...] = jnp.zeros_like(out_r_ref)
        out_f_ref[...] = jnp.zeros_like(out_f_ref)

    def row_sum(sp):
        # (tile_rows, 128) -> (8, 128): elementwise vreg adds only (pure VPU);
        # the cross-lane/sublane reduction is deferred to the wrapper.
        return jnp.sum(sp.reshape(tile_rows // SUBLANES, SUBLANES, LANES), axis=0)

    def softplus(z, absx):
        # Numerically stable softplus(z) = max(z, 0) + log1p(exp(-|z|)), |z|==|x|.
        return jnp.maximum(z, 0.0) + jnp.log1p(jnp.exp(-absx))

    def accumulate(out_ref, x_ref, n_valid: int, negate: bool):
        full = n_valid // tile_elems          # tiles that are entirely valid
        rem = n_valid - full * tile_elems     # valid elements in the ragged tile

        if full > 0:
            @pl.when(t < full)
            def _():
                xf = x_ref[...].astype(jnp.float32)
                z = -xf if negate else xf
                out_ref[...] += row_sum(softplus(z, jnp.abs(xf)))

        if rem > 0:
            @pl.when(t == full)
            def _():
                mask = _edge_mask(tile_rows, rem)
                # Mask the input first: the unfetched part of a partial edge
                # block is unspecified (possibly NaN/Inf) and must never reach
                # exp/max; then mask the result so softplus(0) never leaks in.
                xf = jnp.where(mask, x_ref[...].astype(jnp.float32), 0.0)
                z = -xf if negate else xf
                sp = jnp.where(mask, softplus(z, jnp.abs(xf)), 0.0)
                out_ref[...] += row_sum(sp)
        # Tiles with t past the input extent contribute nothing (skipped).

    accumulate(out_r_ref, real_ref, n_real, negate=True)    # target = 1
    accumulate(out_f_ref, fake_ref, n_fake, negate=False)   # target = 0


def gan_d_loss(scores_real: jax.Array, scores_fake: jax.Array) -> jax.Array:
    """Forward pass of GANDLoss (fused real+fake BCE-with-logits means)."""
    flat_r = scores_real.reshape(-1)
    flat_f = scores_fake.reshape(-1)
    n_r = flat_r.shape[0]
    n_f = flat_f.shape[0]

    rows_max = max(_cdiv(n_r, LANES), _cdiv(n_f, LANES))
    tile_rows = min(MAX_TILE_ROWS,
                    max(ROW_ALIGN, _floor_align(rows_max, ROW_ALIGN)))

    def prep(flat):
        # Reshape to (rows, 128); pad only when unavoidable (n % 128 != 0 or
        # the input is smaller than one tile).  Padded elements are masked
        # in-kernel anyway, so correctness never depends on the pad.
        n = flat.shape[0]
        rows = max(_cdiv(n, LANES), tile_rows)
        total = rows * LANES
        if total != n:
            flat = jnp.pad(flat, (0, total - n))
        return flat.reshape(rows, LANES), rows

    real2d, rows_r = prep(flat_r)
    fake2d, rows_f = prep(flat_f)

    n_tiles = _cdiv(max(rows_r, rows_f), tile_rows)
    num_shards = _num_shards() if n_tiles >= 2 else 1
    k_steps = _cdiv(n_tiles, num_shards)

    last_block_r = _cdiv(rows_r, tile_rows) - 1
    last_block_f = _cdiv(rows_f, tile_rows) - 1

    def in_map(p, k, *, last_block):
        # Clamp so over-covering grid steps / the smaller input never DMA out
        # of range; the revisited block is not re-fetched and its tile is
        # skipped inside the kernel.
        return (jnp.minimum(p * k_steps + k, last_block), 0)

    kernel = functools.partial(
        _gan_d_loss_kernel,
        tile_rows=tile_rows, k_steps=k_steps, n_real=n_r, n_fake=n_f)

    acc_shape = jax.ShapeDtypeStruct((num_shards * SUBLANES, LANES), jnp.float32)

    out_r, out_f = pl.pallas_call(
        kernel,
        out_shape=(acc_shape, acc_shape),
        grid_spec=pltpu.PrefetchScalarGridSpec(
            num_scalar_prefetch=0,
            grid=(num_shards, k_steps),
            in_specs=[
                pl.BlockSpec((tile_rows, LANES),
                             functools.partial(in_map, last_block=last_block_r)),
                pl.BlockSpec((tile_rows, LANES),
                             functools.partial(in_map, last_block=last_block_f)),
            ],
            out_specs=[
                pl.BlockSpec((SUBLANES, LANES), lambda p, k: (p, 0)),
                pl.BlockSpec((SUBLANES, LANES), lambda p, k: (p, 0)),
            ],
        ),
        compiler_params=pltpu.CompilerParams(
            dimension_semantics=("parallel", "arbitrary")),
    )(real2d, fake2d)

    # Single tiny cross-lane reduction + mean division, outside the hot loop.
    return out_r.sum() / n_r + out_f.sum() / n_f


def _reference(scores_real, scores_fake):
    def bce_mean(x, y):
        x = x.reshape(-1).astype(jnp.float32)
        return jnp.mean(jnp.maximum(x, 0) - x * y + jnp.log1p(jnp.exp(-jnp.abs(x))))
    return bce_mean(scores_real, 1.0) + bce_mean(scores_fake, 0.0)


if __name__ == "__main__":
    key = jax.random.PRNGKey(0)
    k1, k2, k3 = jax.random.split(key, 3)

    # Discriminator score maps, NCHW-style shapes (flattened by the loss anyway).
    scores_real = jax.random.normal(k1, (2, 1, 16, 16), dtype=jnp.float32)
    scores_fake = jax.random.normal(k2, (2, 1, 16, 16), dtype=jnp.float32)

    loss = gan_d_loss(scores_real, scores_fake)
    jax.block_until_ready(loss)
    ref = _reference(scores_real, scores_fake)
    assert jnp.allclose(loss, ref, rtol=1e-5, atol=1e-5), (loss, ref)

    # Ragged / unequal-size path: n % 128 != 0 and real/fake lengths differ.
    odd_fake = jax.random.normal(k3, (2, 3, 7, 5), dtype=jnp.float32)
    loss2 = gan_d_loss(scores_real, odd_fake)
    jax.block_until_ready(loss2)
    ref2 = _reference(scores_real, odd_fake)
    assert jnp.allclose(loss2, ref2, rtol=1e-5, atol=1e-5), (loss2, ref2)

    print("KERNEL_OK")
</pallas_src>

<mosaic_0001>
module attributes {stable_mosaic.version = 11 : i64} {
  func.func @_gan_d_loss_kernel(%arg0: i32, %arg1: i32, %arg2: memref<16x128xf32, #tpu.memory_space<vmem>>, %arg3: memref<16x128xf32, #tpu.memory_space<vmem>>, %arg4: memref<8x128xf32, #tpu.memory_space<vmem>>, %arg5: memref<8x128xf32, #tpu.memory_space<vmem>>) attributes {dimension_semantics = [#tpu.dimension_semantics<parallel>, #tpu.dimension_semantics<arbitrary>], iteration_bounds = array<i64: 1, 1>, scalar_prefetch = 0 : i64, scratch_operands = 0 : i64, tpu.core_type = #tpu.core_type<tc>, window_params = [{transform_indices = @transform_0, window_bounds = array<i64: 16, 128>}, {transform_indices = @transform_1, window_bounds = array<i64: 16, 128>}, {transform_indices = @transform_2, window_bounds = array<i64: 8, 128>}, {transform_indices = @transform_3, window_bounds = array<i64: 8, 128>}]} {
    %c1_i32 = arith.constant 1 : i32
    %0 = arith.muli %arg0, %c1_i32 : i32
    %1 = arith.addi %0, %arg1 : i32
    %c0_i32 = arith.constant 0 : i32
    %2 = arith.cmpi eq, %arg1, %c0_i32 : i32
    %3 = arith.extui %2 : i1 to i32
    %c0_i32_0 = arith.constant 0 : i32
    %4 = arith.cmpi ne, %3, %c0_i32_0 : i32
    scf.if %4 {
      %cst = arith.constant 0.000000e+00 : f32
      %11 = vector.broadcast %cst : f32 to vector<8x128xf32>
      %c0 = arith.constant 0 : index
      %c0_5 = arith.constant 0 : index
      %12 = vector.load %arg4[%c0, %c0_5] : memref<8x128xf32, #tpu.memory_space<vmem>>, vector<8x128xf32>
      tpu.vector_store %arg4[%c0, %c0_5], %11 {strides = array<i32>} : memref<8x128xf32, #tpu.memory_space<vmem>>, vector<8x128xf32>,
      %cst_6 = arith.constant 0.000000e+00 : f32
      %13 = vector.broadcast %cst_6 : f32 to vector<8x128xf32>
      %c0_7 = arith.constant 0 : index
      %c0_8 = arith.constant 0 : index
      %14 = vector.load %arg5[%c0_7, %c0_8] : memref<8x128xf32, #tpu.memory_space<vmem>>, vector<8x128xf32>
      tpu.vector_store %arg5[%c0_7, %c0_8], %13 {strides = array<i32>} : memref<8x128xf32, #tpu.memory_space<vmem>>, vector<8x128xf32>,
    } else {
    }
    %c0_i32_1 = arith.constant 0 : i32
    %5 = arith.cmpi eq, %1, %c0_i32_1 : i32
    %6 = arith.extui %5 : i1 to i32
    %c0_i32_2 = arith.constant 0 : i32
    %7 = arith.cmpi ne, %6, %c0_i32_2 : i32
    scf.if %7 {
      %11 = tpu.iota {dimensions = array<i32: 0>} : vector<16x128xi32>
      %c4_i32 = arith.constant 4 : i32
      %12 = vector.broadcast %c4_i32 : i32 to vector<16x128xi32>
      %13 = arith.cmpi slt, %11, %12 : vector<16x128xi32>
      %c0 = arith.constant 0 : index
      %c0_5 = arith.constant 0 : index
      %14 = vector.load %arg2[%c0, %c0_5] : memref<16x128xf32, #tpu.memory_space<vmem>>, vector<16x128xf32>
      %cst = arith.constant 0.000000e+00 : f32
      %15 = vector.broadcast %cst : f32 to vector<16x128xf32>
      %16 = arith.select %13, %14, %15 : vector<16x128xi1>, vector<16x128xf32>
      %cst_6 = arith.constant 0.000000e+00 : f32
      %17 = vector.broadcast %cst_6 : f32 to vector<16x128xf32>
      %18 = arith.subf %17, %16 : vector<16x128xf32>
      %19 = math.absf %16 : vector<16x128xf32>
      %cst_7 = arith.constant 0.000000e+00 : f32
      %20 = vector.broadcast %cst_7 : f32 to vector<16x128xf32>
      %21 = arith.maximumf %18, %20 : vector<16x128xf32>
      %cst_8 = arith.constant 0.000000e+00 : f32
      %22 = vector.broadcast %cst_8 : f32 to vector<16x128xf32>
      %23 = arith.subf %22, %19 : vector<16x128xf32>
      %24 = math.exp %23 : vector<16x128xf32>
      %25 = math.log1p %24 : vector<16x128xf32>
      %26 = arith.addf %21, %25 : vector<16x128xf32>
      %cst_9 = arith.constant 0.000000e+00 : f32
      %27 = vector.broadcast %cst_9 : f32 to vector<16x128xf32>
      %28 = arith.select %13, %26, %27 : vector<16x128xi1>, vector<16x128xf32>
      %c0_10 = arith.constant 0 : index
      %c0_11 = arith.constant 0 : index
      %29 = vector.load %arg4[%c0_10, %c0_11] : memref<8x128xf32, #tpu.memory_space<vmem>>, vector<8x128xf32>
      %30 = vector.shape_cast %28 : vector<16x128xf32> to vector<2x8x128xf32>
      %cst_12 = arith.constant dense<0.000000e+00> : vector<8x128xf32>
      %31 = vector.multi_reduction <add>, %30, %cst_12 [0] : vector<2x8x128xf32> to vector<8x128xf32>
      %32 = arith.addf %29, %31 : vector<8x128xf32>
      %c0_13 = arith.constant 0 : index
      %c0_14 = arith.constant 0 : index
      %33 = vector.load %arg4[%c0_13, %c0_14] : memref<8x128xf32, #tpu.memory_space<vmem>>, vector<8x128xf32>
      tpu.vector_store %arg4[%c0_13, %c0_14], %32 {strides = array<i32>} : memref<8x128xf32, #tpu.memory_space<vmem>>, vector<8x128xf32>,
    } else {
    }
    %c0_i32_3 = arith.constant 0 : i32
    %8 = arith.cmpi eq, %1, %c0_i32_3 : i32
    %9 = arith.extui %8 : i1 to i32
    %c0_i32_4 = arith.constant 0 : i32
    %10 = arith.cmpi ne, %9, %c0_i32_4 : i32
    scf.if %10 {
      %11 = tpu.iota {dimensions = array<i32: 0>} : vector<16x128xi32>
      %c4_i32 = arith.constant 4 : i32
      %12 = vector.broadcast %c4_i32 : i32 to vector<16x128xi32>
      %13 = arith.cmpi slt, %11, %12 : vector<16x128xi32>
      %c0 = arith.constant 0 : index
      %c0_5 = arith.constant 0 : index
      %14 = vector.load %arg3[%c0, %c0_5] : memref<16x128xf32, #tpu.memory_space<vmem>>, vector<16x128xf32>
      %cst = arith.constant 0.000000e+00 : f32
      %15 = vector.broadcast %cst : f32 to vector<16x128xf32>
      %16 = arith.select %13, %14, %15 : vector<16x128xi1>, vector<16x128xf32>
      %17 = math.absf %16 : vector<16x128xf32>
      %cst_6 = arith.constant 0.000000e+00 : f32
      %18 = vector.broadcast %cst_6 : f32 to vector<16x128xf32>
      %19 = arith.maximumf %16, %18 : vector<16x128xf32>
      %cst_7 = arith.constant 0.000000e+00 : f32
      %20 = vector.broadcast %cst_7 : f32 to vector<16x128xf32>
      %21 = arith.subf %20, %17 : vector<16x128xf32>
      %22 = math.exp %21 : vector<16x128xf32>
      %23 = math.log1p %22 : vector<16x128xf32>
      %24 = arith.addf %19, %23 : vector<16x128xf32>
      %cst_8 = arith.constant 0.000000e+00 : f32
      %25 = vector.broadcast %cst_8 : f32 to vector<16x128xf32>
      %26 = arith.select %13, %24, %25 : vector<16x128xi1>, vector<16x128xf32>
      %c0_9 = arith.constant 0 : index
      %c0_10 = arith.constant 0 : index
      %27 = vector.load %arg5[%c0_9, %c0_10] : memref<8x128xf32, #tpu.memory_space<vmem>>, vector<8x128xf32>
      %28 = vector.shape_cast %26 : vector<16x128xf32> to vector<2x8x128xf32>
      %cst_11 = arith.constant dense<0.000000e+00> : vector<8x128xf32>
      %29 = vector.multi_reduction <add>, %28, %cst_11 [0] : vector<2x8x128xf32> to vector<8x128xf32>
      %30 = arith.addf %27, %29 : vector<8x128xf32>
      %c0_12 = arith.constant 0 : index
      %c0_13 = arith.constant 0 : index
      %31 = vector.load %arg5[%c0_12, %c0_13] : memref<8x128xf32, #tpu.memory_space<vmem>>, vector<8x128xf32>
      tpu.vector_store %arg5[%c0_12, %c0_13], %30 {strides = array<i32>} : memref<8x128xf32, #tpu.memory_space<vmem>>, vector<8x128xf32>,
    } else {
    }
    return
  }
  func.func @transform_0(%arg0: i32, %arg1: i32) -> (i32, i32) {
    %c1_i32 = arith.constant 1 : i32
    %0 = arith.muli %arg0, %c1_i32 : i32
    %1 = arith.addi %0, %arg1 : i32
    %c0_i32 = arith.constant 0 : i32
    %2 = arith.minsi %1, %c0_i32 : i32
    %c0_i32_0 = arith.constant 0 : i32
    %c0_i32_1 = arith.constant 0 : i32
    return %2, %c0_i32_0 : i32, i32
  }
  func.func @transform_1(%arg0: i32, %arg1: i32) -> (i32, i32) {
    %c1_i32 = arith.constant 1 : i32
    %0 = arith.muli %arg0, %c1_i32 : i32
    %1 = arith.addi %0, %arg1 : i32
    %c0_i32 = arith.constant 0 : i32
    %2 = arith.minsi %1, %c0_i32 : i32
    %c0_i32_0 = arith.constant 0 : i32
    %c0_i32_1 = arith.constant 0 : i32
    return %2, %c0_i32_0 : i32, i32
  }
  func.func @transform_2(%arg0: i32, %arg1: i32) -> (i32, i32) {
    %c0_i32 = arith.constant 0 : i32
    %c0_i32_0 = arith.constant 0 : i32
    return %arg0, %c0_i32 : i32, i32
  }
  func.func @transform_3(%arg0: i32, %arg1: i32) -> (i32, i32) {
    %c0_i32 = arith.constant 0 : i32
    %c0_i32_0 = arith.constant 0 : i32
    return %arg0, %c0_i32 : i32, i32
  }
}

</mosaic_0001>

<bundles_post_ra>
// kernel: tpu_custom_call.1
= control target key start
LH: loop header
LB: loop body
LE: loop exit
PB: predicated region body
PF: predicated region fallthrough
CT: control target
= control target key end

     0   :  { %9 = vsyncpa [#allocation3], 0  ;;  %s384_s0 = inlined_call_operand.hbm [shape: f32[16,128], index: 0, kind: input, shape index: {}]   ;;  %s385_s1 = inlined_call_operand.hbm [shape: f32[16,128], index: 1, kind: input, shape index: {}]   ;;  %s386_s2 = inlined_call_operand.hbm [shape: f32[8,128], index: 2, kind: output, shape index: {0}]   ;;  %s387_s3 = inlined_call_operand.hbm [shape: f32[8,128], index: 3, kind: output, shape index: {1}]  }
   0x1   :  { %10 = vsyncpa [#allocation6], 0 }
   0x2   :  { %11 = vsyncpa [#allocation4], 0 }
   0x3   :  { %12 = vsyncpa [#allocation9], 0  ;;  %s306_s12 = smov [#allocation2]   ;;  %s210_s16 = scalar_lea.hbm %s384_s0, 256 }
   0x4   :  { %s24_s13 = sshll.u32 %s306_s12, 4  ;;  %p211_p0 = scmp.ne.s32.totalorder %s384_s0, %s210_s16  ;;  %s25_s13 = int_to_ptr.vmem [resolvable:$true] %s24_s13 }
   0x5   :  { %p214_p1 = scmp.lt.u32.totalorder %s210_s16, %s384_s0 }
   0x7   :  { %p216_p2 = pnand %p214_p1, %p211_p0 }
   0x9   :  { %219 = shalt.err (!%p216_p2)
}
   0xa   :  { %s220_s21 = scalar_lea.vmem %s25_s13, 256  ;;  %p225_p4 = scmp.lt.s32.totalorder %s25_s13, %s25_s13 }
   0xb   :  { %p221_p3 = scmp.ne.s32.totalorder %s25_s13, %s220_s21  ;;  %p226_p5 = scmp.lt.s32.totalorder %s220_s21, %s220_s21 }
   0xd   :  { %p227_p6 = por %p226_p5, %p225_p4 }
   0xf   :  { %p228_p7 = pnand %p227_p6, %p221_p3 }
  0x11   :  { %231 = shalt.err (!%p228_p7)
}
  0x12   :  { %s307_s22 = smov 128   ;;  %s308_s23 = smov 8  }
  0x13   :  { %30 = dma.hbm_to_vmem [thread:$0]  %s384_s0, 256, %s25_s13, [#allocation3], %s307_s22, %s307_s22, %s308_s23  }
  0x14   :  { %s309_s26 = smov [#allocation5]   ;;  %s232_s30 = scalar_lea.hbm %s385_s1, 256 }
  0x15   :  { %s42_s27 = sshll.u32 %s309_s26, 4  ;;  %p233_p8 = scmp.ne.s32.totalorder %s385_s1, %s232_s30  ;;  %s43_s27 = int_to_ptr.vmem [resolvable:$true] %s42_s27 }
  0x16   :  { %p236_p9 = scmp.lt.u32.totalorder %s232_s30, %s385_s1 }
  0x18   :  { %p238_p10 = pnand %p236_p9, %p233_p8 }
  0x1a   :  { %241 = shalt.err (!%p238_p10)
}
  0x1b   :  { %s242_s8 = scalar_lea.vmem %s43_s27, 256  ;;  %p247_p12 = scmp.lt.s32.totalorder %s43_s27, %s43_s27 }
  0x1c   :  { %p243_p11 = scmp.ne.s32.totalorder %s43_s27, %s242_s8  ;;  %p248_p13 = scmp.lt.s32.totalorder %s242_s8, %s242_s8 }
  0x1e   :  { %p249_p0 = por %p248_p13, %p247_p12 }
  0x20   :  { %p250_p1 = pnand %p249_p0, %p243_p11 }
  0x22   :  { %253 = shalt.err (!%p250_p1)
}
  0x23   :  { %48 = dma.hbm_to_vmem [thread:$0]  %s385_s1, 256, %s43_s27, [#allocation6], %s307_s22, %s307_s22, %s308_s23  }
  0x24   :  { %298 = dma.done.wait [#allocation3], 256  }
  0x25   :  { %299 = vsyncadd [#allocation3], 4294967040 }
  0x26   :  { %300 = dma.done.wait [#allocation6], 256  }
  0x27   :  { %301 = vsyncadd [#allocation6], 4294967040  ;;  %v74_v0 = vlaneseq  ;;  %v79_v2 = vld [vmem:[#allocation2] sm:$0xff]  ;;  %v121_v3 = vld [vmem:[#allocation5] sm:$0xff]  ;;  %s310_s1 = smov [#allocation7]   ;;  %s311_s11 = smov [#allocation8]  }
  0x28   :  { %s167_s10 = sshll.u32 %s310_s1, 4  ;;  %s177_s12 = sshll.u32 %s311_s11, 4  ;;  %s168_s10 = int_to_ptr.vmem [resolvable:$true] %s167_s10  ;;  %s178_s12 = int_to_ptr.vmem [resolvable:$true] %s177_s12 }
  0x29   :  { %v75_v1 = vshrl.u32 %v74_v0, 7  ;;  %s254_s13 = scalar_lea.vmem %s168_s10, 128  ;;  %p259_p3 = scmp.lt.s32.totalorder %s168_s10, %s168_s10 }
  0x2a   :  { %p255_p2 = scmp.ne.s32.totalorder %s168_s10, %s254_s13  ;;  %p260_p4 = scmp.lt.s32.totalorder %s254_s13, %s254_s13 }
  0x2b   :  { %vm77_vm0 = vcmp.lt.s32.totalorder %v75_v1, 4 }
  0x2c   :  { %v81_v4 = vsel %vm77_vm0, %v79_v2, 0.0  ;;  %v123_v5 = vsel %vm77_vm0, %v121_v3, 0.0  ;;  %p261_p5 = por %p260_p4, %p259_p3 }
  0x2d   :  { %v85_v6 = vand.u32 2147483647, %v81_v4  ;;  %v125_v7 = vand.u32 2147483647, %v123_v5  ;;  %v83_v19 = vsub.f32 0.0, %v81_v4  ;;  %v127_v29 = vmax.f32 %v123_v5, 0.0 }
  0x2e   :  { %p262_p6 = pnand %p261_p5, %p255_p2 }
  0x2f   :  { %v89_v8 = vsub.f32 0.0, %v85_v6  ;;  %v129_v9 = vsub.f32 0.0, %v125_v7  ;;  %v87_v25 = vmax.f32 %v83_v19, 0.0 }
  0x31   :  { %v91_v10 = vmul.f32 1.442695, %v89_v8  ;;  %v131_v11 = vmul.f32 1.442695, %v129_v9 }
  0x33   :  { %202 = vpow2.f32 %v91_v10 }
  0x34   :  { %204 = vpow2.f32 %v131_v11 }
  0x3d   :  { %v203_v12 = vpop.eup %202 }
  0x3e   :  { %v205_v13 = vpop.eup %204  ;;  %v95_v14 = vadd.f32 1.0, %v203_v12  ;;  %v98_v16 = vmul.f32 -0.5, %v203_v12  ;;  %v101_v20 = vand.u32 2147483647, %v203_v12 }
  0x3f   :  { %v135_v15 = vadd.f32 1.0, %v205_v13  ;;  %v138_v17 = vmul.f32 -0.5, %v205_v13  ;;  %v141_v22 = vand.u32 2147483647, %v205_v13 }
  0x40   :  { %206 = vlog2.f32 %v95_v14  ;;  %v99_v18 = vadd.f32 1.0, %v98_v16  ;;  %vm102_vm1 = vcmp.lt.f32.partialorder %v101_v20, 0.0004427343 }
  0x41   :  { %208 = vlog2.f32 %v135_v15  ;;  %v139_v21 = vadd.f32 1.0, %v138_v17  ;;  %vm142_vm2 = vcmp.lt.f32.partialorder %v141_v22, 0.0004427343 }
  0x42   :  { %v100_v23 = vmul.f32 %v203_v12, %v99_v18 }
  0x43   :  { %v140_v26 = vmul.f32 %v205_v13, %v139_v21 }
  0x4a   :  { %v207_v24 = vpop.eup %206 }
  0x4b   :  { %v209_v27 = vpop.eup %208  ;;  %v97_v28 = vmul.f32 0.6931472, %v207_v24 }
  0x4c   :  { %v137_v30 = vmul.f32 0.6931472, %v209_v27 }
  0x4d   :  { %v103_v31 = vsel %vm102_vm1, %v100_v23, %v97_v28 }
  0x4e   :  { %v113_v32 = vadd.f32 %v103_v31, %v87_v25  ;;  %v143_v33 = vsel %vm142_vm2, %v140_v26, %v137_v30 }
  0x4f   :  { %v153_v34 = vadd.f32 %v143_v33, %v127_v29 }
  0x50   :  { %v115_v35 = vsel %vm77_vm0, %v113_v32, 0.0 }
  0x51   :  { %v155_v36 = vsel %vm77_vm0, %v153_v34, 0.0  ;;  %120 = vst [vmem:[#allocation7] sm:$0xff] %v115_v35 }
  0x52   :  { %160 = vst [vmem:[#allocation8] sm:$0xff] %v155_v36 }
  0x53   :  { %265 = shalt.err (!%p262_p6)
}
  0x54   :  { %s266_s16 = scalar_lea.hbm %s386_s2, 128 }
  0x55   :  { %p267_p7 = scmp.ne.s32.totalorder %s386_s2, %s266_s16  ;;  %p270_p8 = scmp.lt.u32.totalorder %s266_s16, %s386_s2 }
  0x57   :  { %p272_p9 = pnand %p270_p8, %p267_p7 }
  0x59   :  { %275 = shalt.err (!%p272_p9)
}
  0x5a   :  { %170 = dma.vmem_to_hbm [thread:$0]  %s168_s10, 128, %s386_s2, [#allocation4]  }
  0x5b   :  { %s276_s23 = scalar_lea.vmem %s178_s12, 128  ;;  %p281_p11 = scmp.lt.s32.totalorder %s178_s12, %s178_s12 }
  0x5c   :  { %p277_p10 = scmp.ne.s32.totalorder %s178_s12, %s276_s23  ;;  %p282_p12 = scmp.lt.s32.totalorder %s276_s23, %s276_s23 }
  0x5e   :  { %p283_p13 = por %p282_p12, %p281_p11 }
  0x60   :  { %p284_p0 = pnand %p283_p13, %p277_p10 }
  0x62   :  { %287 = shalt.err (!%p284_p0)
}
  0x63   :  { %s288_s26 = scalar_lea.hbm %s387_s3, 128 }
  0x64   :  { %p289_p1 = scmp.ne.s32.totalorder %s387_s3, %s288_s26  ;;  %p292_p2 = scmp.lt.u32.totalorder %s288_s26, %s387_s3 }
  0x66   :  { %p294_p3 = pnand %p292_p2, %p289_p1 }
  0x68   :  { %297 = shalt.err (!%p294_p3)
}
  0x69   :  { %180 = dma.vmem_to_hbm [thread:$0]  %s178_s12, 128, %s387_s3, [#allocation9]  }
  0x6a   :  { %302 = dma.done.wait [#allocation4], 128  }
  0x6b   :  { %303 = vsyncadd [#allocation4], 4294967168 }
  0x6c   :  { %304 = dma.done.wait [#allocation9], 128  }
  0x6d   :  { %305 = vsyncadd [#allocation9], 4294967168 }
  0x6e   :  { %187 = vsyncpa [#allocation3], 1 }
  0x6f   :  { %188 = vsyncpa [#allocation6], 1 }
  0x70   :  { %189 = vsyncpa [#allocation4], 1 }
  0x71   :  { %190 = vsyncpa [#allocation9], 1 }

</bundles_post_ra>
